<compile_context>
chip_gen: v7x
topology: tpu7x:2x2x1
jax: 0.10.0
libtpu: 0.0.40
codegen_flags: <defaults>
</compile_context>

<pallas_src>
import functools

import jax
import jax.numpy as jnp
from jax.experimental import pallas as pl
from jax.experimental.pallas import tpu as pltpu

PAD = 128                              # lane width of hidden activations
IN_PAD = 16                            # lanes of the HBM-facing input slab
OUT_PAD = 16                           # lanes of the HBM-facing output slab
DIMS = [9, 64, 128, 64, 16, 9]         # true layer widths
FAN_IN_PAD = [16, 128, 128, 128, 128]  # padded fan_in per packed weight block
ROW_OFF = [0, 16, 144, 272, 400]       # row offset of each block in the slab
W_ROWS = 528                           # sum(FAN_IN_PAD)
NEG_BIAS = -1e30                       # "minus infinity" bias for padded logits


def _round_up(n, m):
    return ((n + m - 1) // m) * m


def _mlp_kernel(x_ref, w_ref, b_ref, o_ref):
    """Full MLP + per-row softmax on one (BT, *) batch tile."""
    # Layer 0: (BT,16) bf16 x (16,128) bf16 -> (BT,128) f32
    z = jnp.dot(x_ref[...], w_ref[0:FAN_IN_PAD[0], :],
                preferred_element_type=jnp.float32)
    h = jnp.maximum(z + b_ref[0:1, :], 0.0)
    # Layers 1..4: clean (BT,128) x (128,128) matmuls (no lane slicing).
    for layer in range(1, 5):
        off = ROW_OFF[layer]
        z = jnp.dot(h.astype(jnp.bfloat16), w_ref[off:off + PAD, :],
                    preferred_element_type=jnp.float32)
        z = z + b_ref[layer:layer + 1, :]
        h = jnp.maximum(z, 0.0) if layer < 4 else z
    # Row-wise softmax.  Padded logit lanes carry a -1e30 bias so their exp
    # underflows to exactly 0 -> no explicit mask needed.  Exact divide keeps
    # each row summing to 1 (cost is negligible; kernel is mem-bound).
    m = jnp.max(h, axis=-1, keepdims=True)
    e = jnp.exp(h - m)
    denom = jnp.sum(e, axis=-1, keepdims=True)
    o_ref[...] = (e / denom)[:, :OUT_PAD]


def init_params(key):
    """PyTorch-style uniform(+-1/sqrt(fan_in)) init, packed into two slabs."""
    w_blocks = []
    b_slab = jnp.zeros((8, PAD), jnp.float32)
    for i in range(5):
        fan_in, fan_out = DIMS[i], DIMS[i + 1]
        key, kw, kb = jax.random.split(key, 3)
        bound = 1.0 / (fan_in ** 0.5)
        w = jax.random.uniform(kw, (fan_in, fan_out), jnp.float32, -bound, bound)
        b = jax.random.uniform(kb, (fan_out,), jnp.float32, -bound, bound)
        w_blk = jnp.zeros((FAN_IN_PAD[i], PAD), jnp.float32)
        w_blk = w_blk.at[:fan_in, :fan_out].set(w)
        w_blocks.append(w_blk)
        b_slab = b_slab.at[i, :fan_out].set(b)
    # Padded logit lanes of the final layer -> -1e30 (softmax mask for free).
    b_slab = b_slab.at[4, DIMS[-1]:].set(NEG_BIAS)
    w_slab = jnp.concatenate(w_blocks, axis=0).astype(jnp.bfloat16)  # (528,128)
    return {"w_slab": w_slab, "b_slab": b_slab}


@functools.partial(jax.jit, static_argnames=("batch_tile",))
def nn_forward_batch(xs, params, *, batch_tile=None):
    """xs: (B, 3, 3) or (B, 9) boards. Returns (B, 9) per-board probabilities."""
    B = xs.shape[0]
    x_flat = jnp.reshape(xs, (B, -1)).astype(jnp.bfloat16)        # (B, 9)
    if batch_tile is None:
        # Large tiles amortize the ~0.35us/step grid overhead; keep >=2 grid
        # steps when possible so both v7x TensorCores get work.
        batch_tile = min(1024, _round_up(max((B + 1) // 2, 1), 8))
    bt = int(batch_tile)
    b_pad = _round_up(B, bt)
    # Narrow (16-lane) bf16 input slab: 8-16x less HBM traffic than a
    # 128-lane f32 slab, and identical numerics (kernel used bf16 anyway).
    x_pad = jnp.zeros((b_pad, IN_PAD), jnp.bfloat16).at[:B, :DIMS[0]].set(x_flat)

    out = pl.pallas_call(
        _mlp_kernel,
        out_shape=jax.ShapeDtypeStruct((b_pad, OUT_PAD), jnp.float32),
        grid=(b_pad // bt,),
        in_specs=[
            pl.BlockSpec((bt, IN_PAD), lambda i: (i, 0)),        # batch tile
            pl.BlockSpec((W_ROWS, PAD), lambda i: (0, 0)),       # weight slab
            pl.BlockSpec((8, PAD), lambda i: (0, 0)),            # bias slab
        ],
        out_specs=pl.BlockSpec((bt, OUT_PAD), lambda i: (i, 0)),
        compiler_params=pltpu.CompilerParams(
            dimension_semantics=("parallel",)),                  # megacore on v7x
    )(x_pad, params["w_slab"], params["b_slab"])
    return out[:B, : DIMS[-1]]


def nn_forward(x, params):
    """Single board, matching the PyTorch module: any x that flattens to 9."""
    return nn_forward_batch(jnp.reshape(x, (1, -1)), params)[0]


def nn_forward_ref(x, params):
    """Plain-JAX reference using the exact (bf16-quantised) packed weights."""
    h = jnp.reshape(x, (-1,)).astype(jnp.float32)
    w_slab = params["w_slab"].astype(jnp.float32)
    for i in range(5):
        fan_in, fan_out = DIMS[i], DIMS[i + 1]
        w = w_slab[ROW_OFF[i]:ROW_OFF[i] + fan_in, :fan_out]
        b = params["b_slab"][i, :fan_out]
        # Match the kernel: activations are cast to bf16 before each matmul.
        h = h.astype(jnp.bfloat16).astype(jnp.float32) @ w + b
        if i < 4:
            h = jnp.maximum(h, 0.0)
    return jax.nn.softmax(h, axis=0)


if __name__ == "__main__":
    key = jax.random.PRNGKey(0)
    kx, kb, kc, kp = jax.random.split(key, 4)
    params = init_params(kp)

    # Single 3x3 board (the module's calling convention: Flatten(0) -> (9,)).
    x = jax.random.normal(kx, (3, 3), jnp.float32)
    probs = jax.block_until_ready(nn_forward(x, params))
    ref = nn_forward_ref(x, params)
    assert probs.shape == (9,)
    assert jnp.allclose(jnp.sum(probs), 1.0, atol=1e-3), float(jnp.sum(probs))
    assert jnp.allclose(probs, ref, atol=2e-2), (probs, ref)

    # Small batch of boards; batch_tile=16 exercises the multi-step grid path.
    xs = jax.random.normal(kb, (40, 3, 3), jnp.float32)
    probs_b = jax.block_until_ready(nn_forward_batch(xs, params, batch_tile=16))
    ref_b = jax.vmap(lambda b: nn_forward_ref(b, params))(xs)
    assert probs_b.shape == (40, 9)
    assert jnp.allclose(probs_b, ref_b, atol=2e-2), float(
        jnp.max(jnp.abs(probs_b - ref_b)))

    # Mid-size batch with the default tile heuristic (2 grid steps + padding).
    xs2 = jax.random.normal(kc, (250, 9), jnp.float32)
    probs_c = jax.block_until_ready(nn_forward_batch(xs2, params))
    ref_c = jax.vmap(lambda b: nn_forward_ref(b, params))(xs2)
    assert probs_c.shape == (250, 9)
    assert jnp.allclose(probs_c, ref_c, atol=2e-2), float(
        jnp.max(jnp.abs(probs_c - ref_c)))

    print("KERNEL_OK")
</pallas_src>

<mosaic_0001>
module attributes {stable_mosaic.version = 11 : i64} {
  func.func @_mlp_kernel(%arg0: i32, %arg1: memref<8x16xbf16, #tpu.memory_space<vmem>>, %arg2: memref<528x128xbf16, #tpu.memory_space<vmem>>, %arg3: memref<8x128xf32, #tpu.memory_space<vmem>>, %arg4: memref<8x16xf32, #tpu.memory_space<vmem>>) attributes {dimension_semantics = [#tpu.dimension_semantics<parallel>], iteration_bounds = array<i64: 1>, scalar_prefetch = 0 : i64, scratch_operands = 0 : i64, tpu.core_type = #tpu.core_type<tc>, window_params = [{transform_indices = @transform_0, window_bounds = array<i64: 8, 16>}, {pipeline_mode = #tpu.pipeline_mode<synchronous>, transform_indices = @transform_1, window_bounds = array<i64: 528, 128>}, {pipeline_mode = #tpu.pipeline_mode<synchronous>, transform_indices = @transform_2, window_bounds = array<i64: 8, 128>}, {transform_indices = @transform_3, window_bounds = array<i64: 8, 16>}]} {
    %c0 = arith.constant 0 : index
    %c0_0 = arith.constant 0 : index
    %0 = vector.load %arg1[%c0, %c0_0] : memref<8x16xbf16, #tpu.memory_space<vmem>>, vector<8x16xbf16>
    %c0_1 = arith.constant 0 : index
    %c0_2 = arith.constant 0 : index
    %1 = vector.load %arg2[%c0_1, %c0_2] : memref<528x128xbf16, #tpu.memory_space<vmem>>, vector<16x128xbf16>
    %cst = arith.constant dense<0.000000e+00> : vector<8x128xf32>
    %2 = tpu.matmul %0, %1, %cst {dimension_numbers = #tpu.dot_dimension_numbers<[1], [0], [0], [1], [0, 0, 1, 1], [], []>} : vector<8x16xbf16>, vector<16x128xbf16>, vector<8x128xf32> -> vector<8x128xf32>
    %c0_3 = arith.constant 0 : index
    %c0_4 = arith.constant 0 : index
    %3 = vector.load %arg3[%c0_3, %c0_4] : memref<8x128xf32, #tpu.memory_space<vmem>>, vector<1x128xf32>
    %4 = vector.broadcast %3 : vector<1x128xf32> to vector<8x128xf32>
    %5 = arith.addf %2, %4 : vector<8x128xf32>
    %cst_5 = arith.constant 0.000000e+00 : f32
    %6 = vector.broadcast %cst_5 : f32 to vector<8x128xf32>
    %7 = arith.maximumf %5, %6 : vector<8x128xf32>
    %8 = arith.truncf %7 : vector<8x128xf32> to vector<8x128xbf16>
    %c16 = arith.constant 16 : index
    %c0_6 = arith.constant 0 : index
    %9 = vector.load %arg2[%c16, %c0_6] : memref<528x128xbf16, #tpu.memory_space<vmem>>, vector<128x128xbf16>
    %cst_7 = arith.constant dense<0.000000e+00> : vector<8x128xf32>
    %10 = tpu.matmul %8, %9, %cst_7 {dimension_numbers = #tpu.dot_dimension_numbers<[1], [0], [0], [1], [0, 0, 1, 1], [], []>} : vector<8x128xbf16>, vector<128x128xbf16>, vector<8x128xf32> -> vector<8x128xf32>
    %c1 = arith.constant 1 : index
    %c0_8 = arith.constant 0 : index
    %11 = vector.load %arg3[%c1, %c0_8] : memref<8x128xf32, #tpu.memory_space<vmem>>, vector<1x128xf32>
    %12 = vector.broadcast %11 : vector<1x128xf32> to vector<8x128xf32>
    %13 = arith.addf %10, %12 : vector<8x128xf32>
    %cst_9 = arith.constant 0.000000e+00 : f32
    %14 = vector.broadcast %cst_9 : f32 to vector<8x128xf32>
    %15 = arith.maximumf %13, %14 : vector<8x128xf32>
    %16 = arith.truncf %15 : vector<8x128xf32> to vector<8x128xbf16>
    %c144 = arith.constant 144 : index
    %c0_10 = arith.constant 0 : index
    %17 = vector.load %arg2[%c144, %c0_10] : memref<528x128xbf16, #tpu.memory_space<vmem>>, vector<128x128xbf16>
    %cst_11 = arith.constant dense<0.000000e+00> : vector<8x128xf32>
    %18 = tpu.matmul %16, %17, %cst_11 {dimension_numbers = #tpu.dot_dimension_numbers<[1], [0], [0], [1], [0, 0, 1, 1], [], []>} : vector<8x128xbf16>, vector<128x128xbf16>, vector<8x128xf32> -> vector<8x128xf32>
    %c2 = arith.constant 2 : index
    %c0_12 = arith.constant 0 : index
    %19 = vector.load %arg3[%c2, %c0_12] : memref<8x128xf32, #tpu.memory_space<vmem>>, vector<1x128xf32>
    %20 = vector.broadcast %19 : vector<1x128xf32> to vector<8x128xf32>
    %21 = arith.addf %18, %20 : vector<8x128xf32>
    %cst_13 = arith.constant 0.000000e+00 : f32
    %22 = vector.broadcast %cst_13 : f32 to vector<8x128xf32>
    %23 = arith.maximumf %21, %22 : vector<8x128xf32>
    %24 = arith.truncf %23 : vector<8x128xf32> to vector<8x128xbf16>
    %c272 = arith.constant 272 : index
    %c0_14 = arith.constant 0 : index
    %25 = vector.load %arg2[%c272, %c0_14] : memref<528x128xbf16, #tpu.memory_space<vmem>>, vector<128x128xbf16>
    %cst_15 = arith.constant dense<0.000000e+00> : vector<8x128xf32>
    %26 = tpu.matmul %24, %25, %cst_15 {dimension_numbers = #tpu.dot_dimension_numbers<[1], [0], [0], [1], [0, 0, 1, 1], [], []>} : vector<8x128xbf16>, vector<128x128xbf16>, vector<8x128xf32> -> vector<8x128xf32>
    %c3 = arith.constant 3 : index
    %c0_16 = arith.constant 0 : index
    %27 = vector.load %arg3[%c3, %c0_16] : memref<8x128xf32, #tpu.memory_space<vmem>>, vector<1x128xf32>
    %28 = vector.broadcast %27 : vector<1x128xf32> to vector<8x128xf32>
    %29 = arith.addf %26, %28 : vector<8x128xf32>
    %cst_17 = arith.constant 0.000000e+00 : f32
    %30 = vector.broadcast %cst_17 : f32 to vector<8x128xf32>
    %31 = arith.maximumf %29, %30 : vector<8x128xf32>
    %32 = arith.truncf %31 : vector<8x128xf32> to vector<8x128xbf16>
    %c400 = arith.constant 400 : index
    %c0_18 = arith.constant 0 : index
    %33 = vector.load %arg2[%c400, %c0_18] : memref<528x128xbf16, #tpu.memory_space<vmem>>, vector<128x128xbf16>
    %cst_19 = arith.constant dense<0.000000e+00> : vector<8x128xf32>
    %34 = tpu.matmul %32, %33, %cst_19 {dimension_numbers = #tpu.dot_dimension_numbers<[1], [0], [0], [1], [0, 0, 1, 1], [], []>} : vector<8x128xbf16>, vector<128x128xbf16>, vector<8x128xf32> -> vector<8x128xf32>
    %c4 = arith.constant 4 : index
    %c0_20 = arith.constant 0 : index
    %35 = vector.load %arg3[%c4, %c0_20] : memref<8x128xf32, #tpu.memory_space<vmem>>, vector<1x128xf32>
    %36 = vector.broadcast %35 : vector<1x128xf32> to vector<8x128xf32>
    %37 = arith.addf %34, %36 : vector<8x128xf32>
    %cst_21 = arith.constant dense<0xFF800000> : vector<8xf32>
    %38 = vector.multi_reduction <maximumf>, %37, %cst_21 [1] : vector<8x128xf32> to vector<8xf32>
    %39 = vector.shape_cast %38 : vector<8xf32> to vector<8x1xf32>
    %40 = vector.broadcast %39 : vector<8x1xf32> to vector<8x128xf32>
    %41 = arith.subf %37, %40 : vector<8x128xf32>
    %42 = math.exp %41 : vector<8x128xf32>
    %cst_22 = arith.constant dense<0.000000e+00> : vector<8xf32>
    %43 = vector.multi_reduction <add>, %42, %cst_22 [1] : vector<8x128xf32> to vector<8xf32>
    %44 = vector.shape_cast %43 : vector<8xf32> to vector<8x1xf32>
    %45 = vector.broadcast %44 : vector<8x1xf32> to vector<8x128xf32>
    %46 = arith.divf %42, %45 : vector<8x128xf32>
    %47 = vector.extract_strided_slice %46 {offsets = [0, 0], sizes = [8, 16], strides = [1, 1]} : vector<8x128xf32> to vector<8x16xf32>
    %c0_23 = arith.constant 0 : index
    %c0_24 = arith.constant 0 : index
    %48 = vector.load %arg4[%c0_23, %c0_24] : memref<8x16xf32, #tpu.memory_space<vmem>>, vector<8x16xf32>
    tpu.vector_store %arg4[%c0_23, %c0_24], %47 {strides = array<i32>} : memref<8x16xf32, #tpu.memory_space<vmem>>, vector<8x16xf32>,
    return
  }
  func.func @transform_0(%arg0: i32) -> (i32, i32) {
    %c0_i32 = arith.constant 0 : i32
    %c0_i32_0 = arith.constant 0 : i32
    return %arg0, %c0_i32 : i32, i32
  }
  func.func @transform_1(%arg0: i32) -> (i32, i32) {
    %c0_i32 = arith.constant 0 : i32
    %c0_i32_0 = arith.constant 0 : i32
    %c0_i32_1 = arith.constant 0 : i32
    return %c0_i32, %c0_i32_0 : i32, i32
  }
  func.func @transform_2(%arg0: i32) -> (i32, i32) {
    %c0_i32 = arith.constant 0 : i32
    %c0_i32_0 = arith.constant 0 : i32
    %c0_i32_1 = arith.constant 0 : i32
    return %c0_i32, %c0_i32_0 : i32, i32
  }
  func.func @transform_3(%arg0: i32) -> (i32, i32) {
    %c0_i32 = arith.constant 0 : i32
    %c0_i32_0 = arith.constant 0 : i32
    return %arg0, %c0_i32 : i32, i32
  }
}

</mosaic_0001>

<bundles_post_ra>
// kernel: nn_forward_batch.1
= control target key start
LH: loop header
LB: loop body
LE: loop exit
PB: predicated region body
PF: predicated region fallthrough
CT: control target
= control target key end

     0   :  { %8 = vsyncpa [#allocation3], 0  ;;  %s775_s12 = smov [#allocation2]   ;;  %s878_s0 = inlined_call_operand.vmem [shape: bf16[8,16], index: 0, kind: input, shape index: {}]   ;;  %s879_s1 = inlined_call_operand.hbm [shape: bf16[528,128], index: 1, kind: input, shape index: {}]   ;;  %s880_s2 = inlined_call_operand.vmem [shape: f32[8,128], index: 2, kind: input, shape index: {}]   ;;  %s881_s3 = inlined_call_operand.vmem [shape: f32[8,16], index: 3, kind: output, shape index: {}]  }
   0x1   :  { %s16_s13 = sshll.u32 %s775_s12, 4  ;;  %s751_s16 = scalar_lea.hbm %s879_s1, 4224  ;;  %s17_s13 = int_to_ptr.vmem [resolvable:$true] %s16_s13 }
   0x2   :  { %p752_p0 = scmp.ne.s32.totalorder %s879_s1, %s751_s16  ;;  %p755_p1 = scmp.lt.u32.totalorder %s751_s16, %s879_s1 }
   0x4   :  { %p757_p2 = pnand %p755_p1, %p752_p0 }
   0x6   :  { %760 = shalt.err (!%p757_p2)
}
   0x7   :  { %s761_s21 = scalar_lea.vmem %s17_s13, 4224  ;;  %p766_p4 = scmp.lt.s32.totalorder %s17_s13, %s17_s13 }
   0x8   :  { %p762_p3 = scmp.ne.s32.totalorder %s17_s13, %s761_s21  ;;  %p767_p5 = scmp.lt.s32.totalorder %s761_s21, %s761_s21 }
   0xa   :  { %p768_p6 = por %p767_p5, %p766_p4 }
   0xc   :  { %p769_p7 = pnand %p768_p6, %p762_p3 }
   0xe   :  { %772 = shalt.err (!%p769_p7)
}
   0xf   :  { %s776_s22 = smov 64   ;;  %s777_s23 = smov 4  }
  0x10   :  { %22 = dma.hbm_to_vmem [thread:$0]  %s879_s1, 4224, %s17_s13, [#allocation3], %s776_s22, %s776_s22, %s777_s23  }
  0x11   :  { %773 = dma.done.wait [#allocation3], 4224  }
  0x12   :  { %774 = vsyncadd [#allocation3], 4294963072  ;;  %v778_v0 = vmov 0.0   ;;  %vm779_vm0 = vmmov 0   ;;  %v714_v1 = vld [vmem:[#allocation2] sm:$0xff]   ;;  %vm43_vm1 = vcmask 130048  }
  0x13   :  { %623 = vmatprep.subr.bf16.mxu0 %v778_v0  ;;  %625 = vmatprep.mubr.msk.bf16.mxu0 %vm779_vm0, %v778_v0  ;;  %v29_v2 = vld [vmem:[%s878_s0] sm:$0xf]  ;;  %v715_v3 = vld [vmem:[#allocation2 + $0x8] sm:$0xff]   ;;  %v716_v4 = vld [vmem:[#allocation2 + $0x10] sm:$0xff]  }
  0x14   :  { %629 = vmatprep.subr.bf16.mxu1 %v778_v0  ;;  %645 = vmatprep.mubr.msk.bf16.mxu1 %vm779_vm0, %v778_v0  ;;  %v717_v5 = vld [vmem:[#allocation2 + $0x18] sm:$0xff]   ;;  %v718_v6 = vld [vmem:[#allocation2 + $0x20] sm:$0xff]   ;;  %v719_v7 = vld [vmem:[#allocation2 + $0x28] sm:$0xff]  }
  0x15   :  { %624 = vmatpush3.bf16.msra.mxu0 %v714_v1  ;;  %630 = vmatpush3.bf16.msra.mxu1 %v715_v3  ;;  %v720_v8 = vld [vmem:[#allocation2 + $0x30] sm:$0xff]   ;;  %v721_v9 = vld [vmem:[#allocation2 + $0x38] sm:$0xff]   ;;  %v722_v10 = vld [vmem:[#allocation2 + $0x40] sm:$0xff]  }
  0x16   :  { %649 = vmatprep.subr.bf16.mxu0 %v778_v0  ;;  %631 = vmatprep.subr.bf16.mxu1 %v778_v0  ;;  %v723_v11 = vld [vmem:[#allocation2 + $0x48] sm:$0xff]   ;;  %v724_v12 = vld [vmem:[#allocation2 + $0x50] sm:$0xff]   ;;  %v725_v13 = vld [vmem:[#allocation2 + $0x58] sm:$0xff]  }
  0x17   :  { %v726_v14 = vld [vmem:[#allocation2 + $0x60] sm:$0xff]   ;;  %v727_v15 = vld [vmem:[#allocation2 + $0x68] sm:$0xff]   ;;  %v728_v16 = vld [vmem:[#allocation2 + $0x70] sm:$0xff]  }
  0x18   :  { %626 = vmatmul.mubr.msk.bf16.vlgmr.msra.gmra.mrb[0].mxu0 %vm43_vm1, %v29_v2  ;;  %v546_v17 = vld [vmem:[%s880_s2] ss:$0 sm:$0xff]  ;;  %v729_v25 = vld [vmem:[#allocation2 + $0x78] sm:$0xff]   ;;  %v731_v27 = vld [vmem:[#allocation2 + $0x88] sm:$0xff]  }
  0x19   :  { %665 = vmatprep.mubr.msk.bf16.mxu0 %vm779_vm0, %v778_v0  ;;  %632 = vmatpush3.bf16.msra.mxu1 %v716_v4  ;;  %v730_v26 = vld [vmem:[#allocation2 + $0x80] sm:$0xff]   ;;  %v732_v28 = vld [vmem:[#allocation2 + $0x90] sm:$0xff]   ;;  %v733_v29 = vld [vmem:[#allocation2 + $0x98] sm:$0xff]  }
  0x1a   :  { %633 = vmatprep.subr.bf16.mxu1 %v778_v0  ;;  %650 = vmatpush3.bf16.msra.mxu0 %v723_v11  ;;  %v734_v30 = vld [vmem:[#allocation2 + $0xa0] sm:$0xff]   ;;  %v735_v31 = vld [vmem:[#allocation2 + $0xa8] sm:$0xff]   ;;  %v736_v32 = vld [vmem:[#allocation2 + $0xb0] sm:$0xff]  }
  0x1b   :  { %651 = vmatprep.subr.bf16.mxu0 %v778_v0  ;;  %v549_v33 = vld [vmem:[%s880_s2 + $0x1] ss:$0 sm:$0xff]  ;;  %v737_v41 = vld [vmem:[#allocation2 + $0xb8] sm:$0xff]   ;;  %v739_v43 = vld [vmem:[#allocation2 + $0xc8] sm:$0xff]  }
  0x1c   :  { %v738_v42 = vld [vmem:[#allocation2 + $0xc0] sm:$0xff]   ;;  %v740_v44 = vld [vmem:[#allocation2 + $0xd0] sm:$0xff]   ;;  %v741_v45 = vld [vmem:[#allocation2 + $0xd8] sm:$0xff]  }
  0x1d   :  { %634 = vmatpush3.bf16.msra.mxu1 %v717_v5  ;;  %v742_v46 = vld [vmem:[#allocation2 + $0xe0] sm:$0xff]   ;;  %v743_v47 = vld [vmem:[#allocation2 + $0xe8] sm:$0xff]   ;;  %v744_v48 = vld [vmem:[#allocation2 + $0xf0] sm:$0xff]  }
  0x1e   :  { %635 = vmatprep.subr.bf16.mxu1 %v778_v0  ;;  %652 = vmatpush3.bf16.msra.mxu0 %v724_v12  ;;  %v558_v49 = vld [vmem:[%s880_s2 + $0x2] ss:$0 sm:$0xff]  ;;  %v745_v57 = vld [vmem:[#allocation2 + $0xf8] sm:$0xff]   ;;  %v567_v59 = vld [vmem:[%s880_s2 + $0x3] ss:$0 sm:$0xff] }
  0x1f   :  { %653 = vmatprep.subr.bf16.mxu0 %v778_v0  ;;  %v746_v58 = vld [vmem:[#allocation2 + $0x100] sm:$0xff]  }
  0x20   :  { %v576_v4 = vld [vmem:[%s880_s2 + $0x4] ss:$0 sm:$0xff] }
  0x21   :  { %636 = vmatpush3.bf16.msra.mxu1 %v718_v6 }
  0x22   :  { %637 = vmatprep.subr.bf16.mxu1 %v778_v0  ;;  %654 = vmatpush3.bf16.msra.mxu0 %v725_v13 }
  0x23   :  { %655 = vmatprep.subr.bf16.mxu0 %v778_v0 }
  0x25   :  { %638 = vmatpush3.bf16.msra.mxu1 %v719_v7 }
  0x26   :  { %639 = vmatprep.subr.bf16.mxu1 %v778_v0  ;;  %656 = vmatpush3.bf16.msra.mxu0 %v726_v14 }
  0x27   :  { %657 = vmatprep.subr.bf16.mxu0 %v778_v0 }
  0x29   :  { %640 = vmatpush3.bf16.msra.mxu1 %v720_v8 }
  0x2a   :  { %641 = vmatprep.subr.bf16.mxu1 %v778_v0  ;;  %658 = vmatpush3.bf16.msra.mxu0 %v727_v15 }
  0x2b   :  { %659 = vmatprep.subr.bf16.mxu0 %v778_v0 }
  0x2d   :  { %642 = vmatpush3.bf16.msra.mxu1 %v721_v9 }
  0x2e   :  { %643 = vmatprep.subr.bf16.mxu1 %v778_v0  ;;  %660 = vmatpush3.bf16.msra.mxu0 %v728_v16 }
  0x2f   :  { %661 = vmatprep.subr.bf16.mxu0 %v778_v0 }
  0x31   :  { %644 = vmatpush3.bf16.msra.mxu1 %v722_v10 }
  0x32   :  { %669 = vmatprep.subr.bf16.mxu1 %v778_v0  ;;  %662 = vmatpush3.bf16.msra.mxu0 %v729_v25 }
  0x33   :  { %663 = vmatprep.subr.bf16.mxu0 %v778_v0 }
  0x36   :  { %664 = vmatpush3.bf16.msra.mxu0 %v730_v26 }
  0x37   :  { %689 = vmatprep.subr.bf16.mxu0 %v778_v0 }
  0xeb   :  { %v81_v18 = vpop.f32.mrb[0].mxu0 }
  0xec   :  { %v82_v19 = vadd.f32 %v546_v17, %v81_v18  ;;  %v627_v20 = vpop.f32.mrb[1].mxu0 }
  0xed   :  { %v84_v21 = vpop.f32.mrb[2].mxu0 }
  0xee   :  { %v87_v22 = vmax.f32 %v82_v19, 0.0  ;;  %v628_v23 = vpop.f32.mrb[3].mxu0 }
  0xf0   :  { %v88_v24 = vpack.c.bf16 %v87_v22, %v87_v22 }
  0xf2   :  { %646 = vmatmul.mubr.bf16.vlgmr.msra.gmra.mrb[0].mxu1 %v88_v24 }
  0xf3   :  { %685 = vmatprep.mubr.msk.bf16.mxu1 %vm779_vm0, %v778_v0  ;;  %670 = vmatpush3.bf16.msra.mxu1 %v731_v27 }
  0xf4   :  { %671 = vmatprep.subr.bf16.mxu1 %v778_v0 }
  0xf7   :  { %672 = vmatpush3.bf16.msra.mxu1 %v732_v28 }
  0xf8   :  { %673 = vmatprep.subr.bf16.mxu1 %v778_v0 }
  0xfb   :  { %674 = vmatpush3.bf16.msra.mxu1 %v733_v29 }
  0xfc   :  { %675 = vmatprep.subr.bf16.mxu1 %v778_v0 }
  0xff   :  { %676 = vmatpush3.bf16.msra.mxu1 %v734_v30 }
 0x100   :  { %677 = vmatprep.subr.bf16.mxu1 %v778_v0 }
 0x103   :  { %678 = vmatpush3.bf16.msra.mxu1 %v735_v31 }
 0x104   :  { %679 = vmatprep.subr.bf16.mxu1 %v778_v0 }
 0x107   :  { %680 = vmatpush3.bf16.msra.mxu1 %v736_v32 }
 0x108   :  { %681 = vmatprep.subr.bf16.mxu1 %v778_v0 }
 0x10b   :  { %682 = vmatpush3.bf16.msra.mxu1 %v737_v41 }
 0x10c   :  { %683 = vmatprep.subr.bf16.mxu1 %v778_v0 }
 0x10f   :  { %684 = vmatpush3.bf16.msra.mxu1 %v738_v42 }
 0x1c5   :  { %v192_v34 = vpop.f32.mrb[0].mxu1 }
 0x1c6   :  { %v193_v35 = vadd.f32 %v549_v33, %v192_v34  ;;  %v647_v36 = vpop.f32.mrb[1].mxu1 }
 0x1c7   :  { %v195_v37 = vpop.f32.mrb[2].mxu1 }
 0x1c8   :  { %v198_v38 = vmax.f32 %v193_v35, 0.0  ;;  %v648_v39 = vpop.f32.mrb[3].mxu1 }
 0x1ca   :  { %v199_v40 = vpack.c.bf16 %v198_v38, %v198_v38 }
 0x1cc   :  { %666 = vmatmul.mubr.bf16.vlgmr.msra.gmra.mrb[4].mxu0 %v199_v40 }
 0x1cd   :  { %705 = vmatprep.mubr.msk.bf16.mxu0 %vm779_vm0, %v778_v0  ;;  %690 = vmatpush3.bf16.msra.mxu0 %v739_v43 }
 0x1ce   :  { %691 = vmatprep.subr.bf16.mxu0 %v778_v0 }
 0x1d1   :  { %692 = vmatpush3.bf16.msra.mxu0 %v740_v44 }
 0x1d2   :  { %693 = vmatprep.subr.bf16.mxu0 %v778_v0 }
 0x1d5   :  { %694 = vmatpush3.bf16.msra.mxu0 %v741_v45 }
 0x1d6   :  { %695 = vmatprep.subr.bf16.mxu0 %v778_v0 }
 0x1d9   :  { %696 = vmatpush3.bf16.msra.mxu0 %v742_v46 }
 0x1da   :  { %697 = vmatprep.subr.bf16.mxu0 %v778_v0 }
 0x1dd   :  { %698 = vmatpush3.bf16.msra.mxu0 %v743_v47 }
 0x1de   :  { %699 = vmatprep.subr.bf16.mxu0 %v778_v0 }
 0x1e1   :  { %700 = vmatpush3.bf16.msra.mxu0 %v744_v48 }
 0x1e2   :  { %701 = vmatprep.subr.bf16.mxu0 %v778_v0 }
 0x1e5   :  { %702 = vmatpush3.bf16.msra.mxu0 %v745_v57 }
 0x1e6   :  { %703 = vmatprep.subr.bf16.mxu0 %v778_v0 }
 0x1e9   :  { %704 = vmatpush3.bf16.msra.mxu0 %v746_v58 }
 0x29f   :  { %v303_v50 = vpop.f32.mrb[4].mxu0 }
 0x2a0   :  { %v304_v51 = vadd.f32 %v558_v49, %v303_v50  ;;  %v667_v52 = vpop.f32.mrb[5].mxu0 }
 0x2a1   :  { %v306_v53 = vpop.f32.mrb[6].mxu0 }
 0x2a2   :  { %v309_v54 = vmax.f32 %v304_v51, 0.0  ;;  %v668_v55 = vpop.f32.mrb[7].mxu0 }
 0x2a4   :  { %v310_v56 = vpack.c.bf16 %v309_v54, %v309_v54 }
 0x2a6   :  { %686 = vmatmul.mubr.bf16.vlgmr.msra.gmra.mrb[4].mxu1 %v310_v56 }
 0x379   :  { %v414_v60 = vpop.f32.mrb[4].mxu1 }
 0x37a   :  { %v415_v61 = vadd.f32 %v567_v59, %v414_v60  ;;  %v687_v62 = vpop.f32.mrb[5].mxu1 }
 0x37b   :  { %v417_v63 = vpop.f32.mrb[6].mxu1 }
 0x37c   :  { %v420_v1 = vmax.f32 %v415_v61, 0.0  ;;  %v688_v2 = vpop.f32.mrb[7].mxu1 }
 0x37e   :  { %v421_v3 = vpack.c.bf16 %v420_v1, %v420_v1 }
 0x380   :  { %706 = vmatmul.mubr.bf16.vlgmr.msra.gmra.mrb[8].mxu0 %v421_v3 }
 0x453   :  { %v525_v5 = vpop.f32.mrb[8].mxu0 }
 0x454   :  { %v526_v0 = vadd.f32 %v576_v4, %v525_v5  ;;  %v707_v6 = vpop.f32.mrb[9].mxu0 }
 0x455   :  { %v528_v7 = vpop.f32.mrb[10].mxu0 }
 0x456   :  { %531 = vmax.xlane.f32.xlu0 %v526_v0  ;;  %v708_v8 = vpop.f32.mrb[11].mxu0 }
 0x4e3   :  { %v532_v9 = vpop.xlane.xlu0 %531 }
 0x4e4   :  { %v533_v10 = vsub.f32 %v526_v0, %v532_v9 }
 0x4e6   :  { %v534_v11 = vmul.f32 1.442695, %v533_v10 }
 0x4e8   :  { %747 = vpow2.f32 %v534_v11 }
 0x4f2   :  { %v748_v12 = vpop.eup %747 }
 0x4f3   :  { %536 = vadd.xlane.f32.xlu0 %v748_v12 }
 0x580   :  { %v537_v13 = vpop.xlane.xlu0 %536 }
 0x581   :  { %749 = vrcp.f32 %v537_v13 }
 0x58b   :  { %v750_v14 = vpop.eup %749 }
 0x58c   :  { %v539_v15 = vmul.f32 %v750_v14, %v748_v12 }
 0x58e   :  { %540 = vst.msk [vmem:[%s881_s3] sm:$0xff] %vm43_vm1, %v539_v15 }
 0x58f   :  { %545 = vsyncpa [#allocation3], 1 }

</bundles_post_ra>
